<compile_context>
chip_gen: v6e
topology: v6e:2x2x1
jax: 0.10.0
libtpu: 0.0.40
codegen_flags: <defaults>
</compile_context>

<pallas_src>
import functools
import math

import jax
import jax.numpy as jnp
from jax import lax
from jax.experimental import pallas as pl
from jax.experimental.pallas import tpu as pltpu


def _combined_margin_kernel(labels_ref, logits_ref, out_ref, *,
                            s, m1, m2, m3, thr, bc):
    j = pl.program_id(0)                     # class-block index (leading axis)
    lab = labels_ref[...]                    # (bm, 1) int32
    x = logits_ref[...]                      # (bm, bc), native dtype

    # Fold the block offset into the labels: one (bm,1) op instead of a
    # full-tile iota add.  Rows without a positive class (-1) get a sentinel
    # that can never match a lane index.
    lab_local = jnp.where(lab == -1, jnp.int32(-1 - bc), lab - j * bc)

    # Scalar flag: does this class-block contain any target at all?
    has_target = jnp.any((lab_local >= 0) & (lab_local < bc))

    def filtered(xt, is_target):
        # inter-class filtering: zero logits above the threshold, except the
        # target logit of rows with a valid label (single VPU select).
        if thr <= 0.0:
            return xt
        dirty = xt > thr
        if is_target is not None:
            dirty = dirty & jnp.logical_not(is_target)
        return jnp.where(dirty, 0.0, xt)

    @pl.when(jnp.logical_not(has_target))
    def _fast_path():
        # No target in this class-block: filter (optional) + scale, in the
        # logits' native dtype (bf16 stays bf16 on v6e/v7x).
        xt = filtered(x, None)
        out_ref[...] = (xt * s).astype(out_ref.dtype)

    @pl.when(has_target)
    def _margin_path():
        lane = lax.broadcasted_iota(jnp.int32, x.shape, 1)
        is_target = lane == lab_local        # (bm,1) broadcasts against lanes
        xt = filtered(x, is_target)
        xf = xt.astype(jnp.float32)          # margin arithmetic in f32
        if m1 == 1.0 and m3 == 0.0:
            # ArcFace: cos(arccos(x) + m2) = x*cos(m2) - sqrt(1 - x^2)*sin(m2),
            # applied at the target position only; non-target entries stay x
            # (cos o arccos is the identity).  cos_m / sin_m fold at trace
            # time.  sqrt argument clamped at 0: torch would NaN for |x| > 1,
            # here such entries behave like a clamped arccos (documented
            # deviation; cosine inputs are in [-1, 1] in practice).
            cos_m = math.cos(m2)
            sin_m = math.sin(m2)
            margined = xf * cos_m - jnp.sqrt(jnp.maximum(1.0 - xf * xf, 0.0)) * sin_m
        elif m3 > 0.0:
            # CosFace-style additive margin on the target logit only.
            margined = xf - m3
        else:
            # matches the bare `raise` in the torch module
            raise ValueError("unsupported (m1, m3) combination")
        out = jnp.where(is_target, margined, xf) * s
        out_ref[...] = out.astype(out_ref.dtype)


def combined_margin_loss(logits, labels, *, s=64.0, m1=1.0, m2=0.5, m3=0.0,
                         interclass_filtering_threshold=0.0,
                         bm=256, bc=4096):
    """Pallas TPU implementation of CombinedMarginLoss.forward.

    The output aliases the logits buffer (input_output_aliases); for the
    aliasing to be real (no hidden B x C copy) call this under
    jax.jit(..., donate_argnums=<logits argnum>) and do not reuse `logits`
    afterwards.
    """
    if not (m1 == 1.0 and m3 == 0.0) and not (m3 > 0.0):
        # matches the bare `raise` in the torch module
        raise ValueError("unsupported (m1, m3) combination")

    B, C = logits.shape
    # Effective tile: use the full dimension when the array is smaller than
    # the requested tile (lifts the (8,128) divisibility requirement);
    # otherwise use the requested multiple-of-(8,128) tile and let pl.cdiv
    # handle ragged edges.
    bm_eff = B if B <= bm else bm
    bc_eff = C if C <= bc else bc

    labels2d = labels.reshape(B, 1).astype(jnp.int32)

    kernel = functools.partial(
        _combined_margin_kernel,
        s=float(s), m1=float(m1), m2=float(m2), m3=float(m3),
        thr=float(interclass_filtering_threshold), bc=bc_eff)

    n_row = pl.cdiv(B, bm_eff)
    n_cls = pl.cdiv(C, bc_eff)
    # Class axis leads the grid so the megacore partitioner can split across
    # TensorCores even when B (hence the row grid) is 1.
    grid = (n_cls, n_row)

    # ~2x(in + out) blocks resident (double-buffered); set an explicit VMEM
    # limit with headroom so the scoped default never clips the tiles.
    blk_bytes = bm_eff * bc_eff * jnp.dtype(logits.dtype).itemsize
    vmem_limit = int(min(max(6 * blk_bytes, 32 << 20), 48 << 20))

    return pl.pallas_call(
        kernel,
        out_shape=jax.ShapeDtypeStruct((B, C), logits.dtype),
        grid_spec=pl.GridSpec(
            grid=grid,
            in_specs=[
                pl.BlockSpec((bm_eff, 1), lambda j, i: (i, 0)),        # labels
                pl.BlockSpec((bm_eff, bc_eff), lambda j, i: (i, j)),   # logits
            ],
            out_specs=pl.BlockSpec((bm_eff, bc_eff), lambda j, i: (i, j)),
        ),
        # logits are fully overwritten -> reuse the input HBM buffer.
        input_output_aliases={1: 0},
        compiler_params=pltpu.CompilerParams(
            dimension_semantics=("parallel", "parallel"),
            vmem_limit_bytes=vmem_limit),
    )(labels2d, logits)


def _reference(logits, labels, *, s, m1, m2, m3, thr):
    # pure-JAX reference mirroring the torch code (ArcFace / CosFace branches)
    B, C = logits.shape
    col = jnp.arange(C)[None, :]
    lab = labels[:, None]
    pos = lab != -1
    tgt = (col == lab) & pos
    x = logits.astype(jnp.float32)
    if thr > 0.0:
        dirty = (x > thr).astype(jnp.float32)
        dirty = jnp.where(tgt, 0.0, dirty)
        x = (1.0 - dirty) * x
    if m1 == 1.0 and m3 == 0.0:
        theta = jnp.arccos(x)
        theta = jnp.where(tgt, theta + m2, theta)
        return jnp.cos(theta) * s
    elif m3 > 0.0:
        return jnp.where(tgt, x - m3, x) * s
    else:
        raise ValueError


if __name__ == "__main__":
    # The torch __init__ has no weights, only margin hyper-parameters.
    B, C = 8, 512
    key = jax.random.PRNGKey(0)
    k_logit, k_label, k2, k3 = jax.random.split(key, 4)
    # logits are cosine similarities, so keep them strictly inside (-1, 1)
    logits = jax.random.uniform(k_logit, (B, C), jnp.float32,
                                minval=-0.99, maxval=0.99)
    labels = jax.random.randint(k_label, (B,), 0, C, dtype=jnp.int32)
    labels = labels.at[3].set(-1)   # one row with no positive class

    # --- ArcFace branch (m1=1, m2=0.5, m3=0), no filtering -----------------
    # bc=128 -> 4 class blocks: exercises both the fast (no-target) path and
    # the margin path.  jit + donate_argnums makes the output alias the
    # logits buffer for real (no defensive XLA copy of the B x C input).
    s, m1, m2, m3, thr = 64.0, 1.0, 0.5, 0.0, 0.0
    ref = _reference(logits, labels, s=s, m1=m1, m2=m2, m3=m3, thr=thr)
    arc_fn = jax.jit(
        functools.partial(combined_margin_loss, s=s, m1=m1, m2=m2, m3=m3,
                          interclass_filtering_threshold=thr, bm=256, bc=128),
        donate_argnums=(0,))
    out = jax.block_until_ready(arc_fn(logits, labels))
    assert out.shape == (B, C) and out.dtype == jnp.float32
    assert jnp.allclose(out, ref, atol=1e-3, rtol=1e-3)

    # --- CosFace branch (m3>0) with inter-class filtering ------------------
    s2, m3_2, thr2 = 64.0, 0.35, 0.1
    logits2 = jax.random.uniform(k2, (B, C), jnp.float32,
                                 minval=-0.99, maxval=0.99)
    ref2 = _reference(logits2, labels, s=s2, m1=1.0, m2=0.0, m3=m3_2, thr=thr2)
    out2 = jax.block_until_ready(
        combined_margin_loss(logits2, labels, s=s2, m1=1.0, m2=0.0, m3=m3_2,
                             interclass_filtering_threshold=thr2))
    assert jnp.allclose(out2, ref2, atol=1e-3, rtol=1e-3)

    # --- bf16 logits: fast/scale path stays in native bf16 -----------------
    logits3_f32 = jax.random.uniform(k3, (B, C), jnp.float32,
                                     minval=-0.99, maxval=0.99)
    logits3_bf16 = logits3_f32.astype(jnp.bfloat16)
    ref3 = _reference(logits3_bf16.astype(jnp.float32), labels,
                      s=s, m1=m1, m2=m2, m3=m3, thr=0.0)
    out3 = jax.block_until_ready(
        combined_margin_loss(logits3_bf16, labels, s=s, m1=m1, m2=m2, m3=m3,
                             interclass_filtering_threshold=0.0, bc=128))
    assert out3.dtype == jnp.bfloat16
    assert jnp.allclose(out3.astype(jnp.float32), ref3, atol=0.5, rtol=1e-2)

    # TODO(synk): forward-only; the torch no_grad/index_put gradient shaping of
    # the filtering + arccos path would need a custom VJP if used for training.
    print("KERNEL_OK")
</pallas_src>

<mosaic_0001>
module attributes {stable_mosaic.version = 11 : i64} {
  func.func @_combined_margin_kernel(%arg0: i32, %arg1: i32, %arg2: memref<8x1xi32, #tpu.memory_space<vmem>>, %arg3: memref<8x128xf32, #tpu.memory_space<vmem>>, %arg4: memref<8x128xf32, #tpu.memory_space<vmem>>) attributes {dimension_semantics = [#tpu.dimension_semantics<parallel>, #tpu.dimension_semantics<parallel>], iteration_bounds = array<i64: 4, 1>, scalar_prefetch = 0 : i64, scratch_operands = 0 : i64, tpu.core_type = #tpu.core_type<tc>, window_params = [{transform_indices = @transform_0, window_bounds = array<i64: 8, 1>}, {transform_indices = @transform_1, window_bounds = array<i64: 8, 128>}, {transform_indices = @transform_2, window_bounds = array<i64: 8, 128>}]} {
    %c0 = arith.constant 0 : index
    %c0_0 = arith.constant 0 : index
    %0 = vector.load %arg2[%c0, %c0_0] : memref<8x1xi32, #tpu.memory_space<vmem>>, vector<8x1xi32>
    %c0_1 = arith.constant 0 : index
    %c0_2 = arith.constant 0 : index
    %1 = vector.load %arg3[%c0_1, %c0_2] : memref<8x128xf32, #tpu.memory_space<vmem>>, vector<8x128xf32>
    %c-1_i32 = arith.constant -1 : i32
    %2 = vector.broadcast %c-1_i32 : i32 to vector<8x1xi32>
    %3 = arith.cmpi eq, %0, %2 : vector<8x1xi32>
    %c128_i32 = arith.constant 128 : i32
    %4 = arith.muli %arg0, %c128_i32 : i32
    %5 = vector.broadcast %4 : i32 to vector<8x1xi32>
    %6 = arith.subi %0, %5 : vector<8x1xi32>
    %c-129_i32 = arith.constant -129 : i32
    %7 = vector.broadcast %c-129_i32 : i32 to vector<8x1xi32>
    %8 = arith.select %3, %7, %6 : vector<8x1xi1>, vector<8x1xi32>
    %c0_i32 = arith.constant 0 : i32
    %9 = vector.broadcast %c0_i32 : i32 to vector<8x1xi32>
    %10 = arith.cmpi sge, %8, %9 : vector<8x1xi32>
    %c128_i32_3 = arith.constant 128 : i32
    %11 = vector.broadcast %c128_i32_3 : i32 to vector<8x1xi32>
    %12 = arith.cmpi slt, %8, %11 : vector<8x1xi32>
    %13 = arith.andi %10, %12 : vector<8x1xi1>
    %cst = arith.constant 1.000000e+00 : f32
    %cst_4 = arith.constant 0.000000e+00 : f32
    %14 = vector.broadcast %cst : f32 to vector<8x1xf32>
    %15 = vector.broadcast %cst_4 : f32 to vector<8x1xf32>
    %16 = arith.select %13, %14, %15 : vector<8x1xi1>, vector<8x1xf32>
    %17 = vector.shape_cast %16 : vector<8x1xf32> to vector<1x8x1xf32>
    %cst_5 = arith.constant dense<0xFF800000> : vector<1xf32>
    %18 = vector.multi_reduction <maximumf>, %17, %cst_5 [1, 2] : vector<1x8x1xf32> to vector<1xf32>
    %19 = vector.shape_cast %18 : vector<1xf32> to vector<1x1x1xf32>
    %20 = vector.extract %19[0, 0, 0] : f32 from vector<1x1x1xf32>
    %cst_6 = arith.constant 0.000000e+00 : f32
    %21 = arith.cmpf ogt, %20, %cst_6 : f32
    %true = arith.constant true
    %22 = arith.xori %21, %true : i1
    %23 = arith.extui %22 : i1 to i32
    %c0_i32_7 = arith.constant 0 : i32
    %24 = arith.cmpi ne, %23, %c0_i32_7 : i32
    scf.if %24 {
      %cst_9 = arith.constant 6.400000e+01 : f32
      %27 = vector.broadcast %cst_9 : f32 to vector<8x128xf32>
      %28 = arith.mulf %1, %27 : vector<8x128xf32>
      %c0_10 = arith.constant 0 : index
      %c0_11 = arith.constant 0 : index
      %29 = vector.load %arg4[%c0_10, %c0_11] : memref<8x128xf32, #tpu.memory_space<vmem>>, vector<8x128xf32>
      tpu.vector_store %arg4[%c0_10, %c0_11], %28 {strides = array<i32>} : memref<8x128xf32, #tpu.memory_space<vmem>>, vector<8x128xf32>,
    } else {
    }
    %25 = arith.extui %21 : i1 to i32
    %c0_i32_8 = arith.constant 0 : i32
    %26 = arith.cmpi ne, %25, %c0_i32_8 : i32
    scf.if %26 {
      %27 = tpu.iota {dimensions = array<i32: 1>} : vector<8x128xi32>
      %28 = vector.broadcast %8 : vector<8x1xi32> to vector<8x128xi32>
      %29 = arith.cmpi eq, %27, %28 : vector<8x128xi32>
      %cst_9 = arith.constant 0.87758255 : f32
      %30 = vector.broadcast %cst_9 : f32 to vector<8x128xf32>
      %31 = arith.mulf %1, %30 : vector<8x128xf32>
      %32 = arith.mulf %1, %1 : vector<8x128xf32>
      %cst_10 = arith.constant 1.000000e+00 : f32
      %33 = vector.broadcast %cst_10 : f32 to vector<8x128xf32>
      %34 = arith.subf %33, %32 : vector<8x128xf32>
      %cst_11 = arith.constant 0.000000e+00 : f32
      %35 = vector.broadcast %cst_11 : f32 to vector<8x128xf32>
      %36 = arith.maximumf %34, %35 : vector<8x128xf32>
      %37 = math.sqrt %36 : vector<8x128xf32>
      %cst_12 = arith.constant 0.47942555 : f32
      %38 = vector.broadcast %cst_12 : f32 to vector<8x128xf32>
      %39 = arith.mulf %37, %38 : vector<8x128xf32>
      %40 = arith.subf %31, %39 : vector<8x128xf32>
      %41 = arith.select %29, %40, %1 : vector<8x128xi1>, vector<8x128xf32>
      %cst_13 = arith.constant 6.400000e+01 : f32
      %42 = vector.broadcast %cst_13 : f32 to vector<8x128xf32>
      %43 = arith.mulf %41, %42 : vector<8x128xf32>
      %c0_14 = arith.constant 0 : index
      %c0_15 = arith.constant 0 : index
      %44 = vector.load %arg4[%c0_14, %c0_15] : memref<8x128xf32, #tpu.memory_space<vmem>>, vector<8x128xf32>
      tpu.vector_store %arg4[%c0_14, %c0_15], %43 {strides = array<i32>} : memref<8x128xf32, #tpu.memory_space<vmem>>, vector<8x128xf32>,
    } else {
    }
    return
  }
  func.func @transform_0(%arg0: i32, %arg1: i32) -> (i32, i32) {
    %c0_i32 = arith.constant 0 : i32
    %c0_i32_0 = arith.constant 0 : i32
    return %arg1, %c0_i32 : i32, i32
  }
  func.func @transform_1(%arg0: i32, %arg1: i32) -> (i32, i32) {
    %c0_i32 = arith.constant 0 : i32
    return %arg1, %arg0 : i32, i32
  }
  func.func @transform_2(%arg0: i32, %arg1: i32) -> (i32, i32) {
    %c0_i32 = arith.constant 0 : i32
    return %arg1, %arg0 : i32, i32
  }
}

</mosaic_0001>

<bundles_post_ra>
// kernel: combined_margin_loss.1
= control target key start
LH: loop header
LB: loop body
LE: loop exit
PB: predicated region body
PF: predicated region fallthrough
CT: control target
= control target key end

     0   :  { %7 = vsyncpa [#allocation3], 0  ;;  %s723_s0 = inlined_call_operand.vmem [shape: s32[8,1], index: 0, kind: input, shape index: {}]   ;;  %s724_s1 = inlined_call_operand.hbm [shape: f32[8,512], index: 1, kind: input, shape index: {}, may-alias: {1,2}]   ;;  %s725_s2 = inlined_call_operand.hbm [shape: f32[8,512], index: 2, kind: output, shape index: {}, may-alias: {1,2}]  }
   0x1   :  { %9 = vsyncpa [#allocation3 + $0x1], 0 }
   0x2   :  { %10 = vsyncpa [#allocation4], 0 }
   0x3   :  { %12 = vsyncpa [#allocation4 + $0x1], 0  ;;  %s573_s9 = smov 0   ;;  %s575_s10 = smov 0  }
   0x4   :  { %s577_s11 = smov 0   ;;  %s579_s12 = smov 0  }
   0x5   :  { %s581_s13 = smov 0   ;;  %s583_s14 = smov 0  }
   0x6 LB: > { %s360_s15 = sadd.s32 4294967295, %s552_s14   ;;  %s361_s16 = sadd.s32 4294967294, %s552_s14   ;;  %s552_s14 = sphi %s583_s14, %s18_s14   ;;  %s548_s13 = sphi %s581_s13, %s736_s13   ;;  %s544_s12 = sphi %s579_s12, %s735_s12   ;;  %s540_s11 = sphi %s577_s11, %s734_s11   ;;  %s536_s10 = sphi %s575_s10, %s733_s10   ;;  %s532_s9 = sphi %s573_s9, %s732_s9  }
   0x7   : > { %s30_s17 = sadd.s32 1, %s548_s13  ;;  %s65_s18 = sadd.s32 1, %s540_s11 }
   0x8   : > { %p32_p0 = scmp.ge.s32.totalorder %s30_s17, 4  ;;  %p72_p1 = scmp.ne.s32.totalorder %s540_s11, %s536_s10 }
   0x9   : > { %p73_p2 = scmp.eq.s32.totalorder %s552_s14, 0  ;;  %p78_p3 = scmp.ne.s32.totalorder %s536_s10, %s532_s9 }
   0xa   : > { %s738_s17 = smov (%p32_p0, %s30_s17), 0  ;;  %p79_p5 = scmp.eq.s32.totalorder %s360_s15, 0 }
   0xb   : > { %p614_p4 = por %p73_p2, %p72_p1  ;;  %s61_s20 = ssub.s32 %s548_s13, %s738_s17 }
   0xc   : > { %p104_p6 = scmp.eq.s32.totalorder %s360_s15, 3  ;;  %p63_p7 = scmp.eq.s32.totalorder %s61_s20, 0 }
   0xd   : > { %p620_p8 = por %p79_p5, %p78_p3  ;;  %p110_p10 = scmp.eq.s32.totalorder %s361_s16, 3 }
   0xe   : > { %p624_p9 = por %p104_p6, %p72_p1  ;;  %p389_p12 = scmp.lt.s32.totalorder %s552_s14, 4 }
   0xf   : > { %s629_s23 = scalar_select %p63_p7, %s540_s11, %s65_s18  }
  0x10   : > { %p631_p11 = por %p110_p10, %p78_p3  ;;  %s137_s25 = sand.u32 1, %s540_s11  }
  0x11   : > { %s365_s26 = sshll.u32 %s137_s25, 3  ;;  %s366_s27 = sshll.u32 %s548_s13, 7 }
  0x12   : > { %s729_s24 = scalar_select %p631_p11, 1, 0 }
  0x13   : > { %s148_s30 = scalar_lea.hbm %s724_s1, %s366_s27  ;;  %s141_s3 = scalar_lea.vmem [#allocation2], %s365_s26 }
  0x14   : > { %s150_s4 = sshll.u32 %s141_s3, 4  ;;  %p643_p13 = pnand %p389_p12, %p614_p4  ;;  %s151_s4 = int_to_ptr.vmem [resolvable:$true] %s150_s4 }
  0x15   : > { %p367_p0 = scmp.ge.s32.totalorder %s552_s14, 1  ;;  %p155_p1 = scmp.lt.s32.totalorder %s552_s14, 5 }
  0x16   : > { %s138_s6 = scalar_lea.sflag [#allocation3], %s137_s25  ;;  %p446_p2 = pneg %p643_p13 }
  0x17   : > { %s457_s7 = scalar_lea.vmem %s151_s4, 128  ;;  %s554_s8 = smov [#allocation2]  }
  0x18   : > { %p458_p3 = scmp.ne.s32.totalorder %s151_s4, %s457_s7  ;;  %s462_s15 = sshll.u32 %s554_s8, 4  ;;  %s463_s15 = int_to_ptr.vmem [resolvable:$false] %s462_s15 }
  0x19   : > { %s464_s16 = scalar_lea.vmem %s463_s15, 256  ;;  %p465_p7 = scmp.lt.s32.totalorder %s151_s4, %s463_s15 }
  0x1a   : > { %p460_p5 = pnand %p458_p3, %p446_p2  ;;  %p466_p10 = scmp.lt.s32.totalorder %s464_s16, %s457_s7 }
  0x1c   : > { %p461_p6 = pneg %p460_p5  ;;  %p467_p4 = por %p466_p10, %p465_p7 }
  0x1e   : > { %p468_p12 = pnand %p467_p4, %p461_p6 }
  0x20   : > { %471 = shalt.err (!%p468_p12)
}
  0x21   : > { %384 = dma.hbm_to_vmem [thread:$0]  (!%p643_p13), %s148_s30, 128, %s151_s4, %s138_s6  }
  0x22   : > { %p156_p11 = pnand %p367_p0, %p155_p1 }
  0x23   : > { %s658_s18 = sand.u32 (!%p156_p11), 1, %s536_s10  }
  0x24   : > { %159 = sbr.rel (%p156_p11) target bundleno = 414 (0x19e), region = 28  ;;  %s368_s19 = sshll.u32 (!%p156_p11), %s658_s18, 3 }
  0x25   : > { %s162_s20 = scalar_lea.sflag (!%p156_p11), [#allocation3], %s658_s18  ;;  %s165_s25 = scalar_lea.vmem (!%p156_p11), [#allocation2], %s368_s19 }
  0x29   : > { %523 = dma.done.wait (%p620_p8), %s162_s20, 128  }
  0x2a   : > { %525 = vsyncadd (%p620_p8), %s162_s20, 4294967168  ;;  %s370_s26 = sshll.u32 %s544_s12, 7  ;;  %v195_v1 = vld [vmem:[%s165_s25] sm:$0xff]  ;;  %vm205_vm3 = vcmask 7168   ;;  %v555_v5 = vmov 0.0   ;;  %s676_s29 = scalar_lea.vmem [#allocation5], %s368_s19 }
  0x2b   : > { %v198_v0 = vstv %s370_s26  ;;  %v194_v2 = vld [vmem:[%s723_s0] sm:$0xff] }
  0x2c   : > { %vm196_vm0 = vcmp.eq.s32.totalorder %v194_v2, 4294967295  ;;  %v199_v3 = vsub.s32 %v194_v2, %v198_v0 }
  0x2e   : > { %v200_v4 = vsel %vm196_vm0, 4294967167, %v199_v3 }
  0x2f   : > { %vm201_vm1 = vcmp.ge.s32.totalorder %v200_v4, 0  ;;  %vm202_vm2 = vcmp.lt.s32.totalorder %v200_v4, 128 }
  0x30   : > { %vm203_vm4 = vmand %vm201_vm1, %vm202_vm2 }
  0x31   : > { %v204_v6 = vsel %vm203_vm4, 1.0, %v555_v5 }
  0x32   : > { %v206_v7 = vsel %vm205_vm3, %v204_v6, -inf }
  0x33   : > { %207 = vmax.xlane.f32.xlu0 %v206_v7 }
  0xbc   : > { %v208_v8 = vpop.xlane.xlu0 %207 }
  0xbd   : > { %v209_v9 = vrot.slane %v208_v8, 4 }
  0xbf   : > { %v210_v10 = vmax.f32 %v208_v8, %v209_v9 }
  0xc1   : > { %v211_v11 = vrot.slane %v210_v10, 2 }
  0xc3   : > { %v212_v12 = vmax.f32 %v210_v10, %v211_v11 }
  0xc5   : > { %v213_v13 = vrot.slane %v212_v12, 1 }
  0xc7   : > { %v214_v14 = vmax.f32 %v212_v12, %v213_v13 }
  0xc9   : > { %375 = vpush %v214_v14 }
  0xfa   : > { %s376_s21 = spop %375 }
  0xfb   : > { %p216_p8 = scmp.gt.f32.partialorder %s376_s21, 0.0 }
  0xfc   : > { %v556_v15 = vmov (%p216_p8), 0   ;;  %v227_v16 = vmul.f32 (%p216_p8), %v195_v1, %v195_v1  ;;  %v220_v24 = vlaneseq (%p216_p8)  ;;  %v226_v25 = vmul.f32 (%p216_p8), 0.87758255, %v195_v1 }
  0xfd   : > { %219 = sbr.rel (!%p216_p8) target bundleno = 383 (0x17f), region = 36  ;;  %441 = vset.pattern.permute.xlu0 (%p216_p8), %v556_v15 }
  0xfe   : > { %223 = vperm.xlu0 (%p216_p8), %441, %v200_v4   ;;  %v228_v17 = vsub.f32 (%p216_p8), 1.0, %v227_v16  ;;  %v221_v27 = vand.u32 (%p216_p8), 127, %v220_v24 }
 0x100   : > { %v229_v18 = vmax.f32 (%p216_p8), %v228_v17, 0.0 }
 0x102   : > { %442 = vrsqrt.f32 %v229_v18  ;;  %vm232_vm5 = vcmp.eq.f32.partialorder %v229_v18, inf  ;;  %v235_v21 = vand.u32 2147483648, %v229_v18  ;;  %vm234_vm6 = vcmp.eq.f32.partialorder %v229_v18, 0.0 }
 0x10f   : > { %v443_v19 = vpop.eup %442 }
 0x110   : > { %v231_v20 = vmul.f32 %v443_v19, %v229_v18 }
 0x112   : > { %v233_v22 = vsel %vm232_vm5, %v229_v18, %v231_v20 }
 0x113   : > { %v236_v23 = vsel %vm234_vm6, %v235_v21, %v233_v22 }
 0x114   : > { %v237_v26 = vmul.f32 0.47942555, %v236_v23 }
 0x116   : > { %v238_v28 = vsub.f32 %v226_v25, %v237_v26 }
 0x179   : > { %v224_v29 = vpop.permute.xlu0 %223 }
 0x17a   : > { %vm225_vm7 = vcmp.eq.s32.totalorder %v221_v27, %v224_v29 }
 0x17b   : > { %v239_v30 = vsel %vm225_vm7, %v238_v28, %v195_v1 }
 0x17c   : > { %v240_v31 = vmul.f32 64.0, %v239_v30 }
 0x17e   : > { %241 = vst [vmem:[%s676_s29] sm:$0xff] %v240_v31 }
 0x17f PF: > { %244 = sbr.rel (%p216_p8) target bundleno = 391 (0x187), region = 40 }
 0x184   : > { %v245_v32 = vmul.f32 64.0, %v195_v1 }
 0x186   : > { %246 = vst [vmem:[%s676_s29] sm:$0xff] %v245_v32 }
 0x187 PF: > { %s261_s4 = scalar_lea.hbm %s725_s2, %s370_s26  ;;  %s263_s5 = sshll.u32 %s676_s29, 4  ;;  %s264_s5 = int_to_ptr.vmem [resolvable:$true] %s263_s5 }
 0x188   : > { %s248_s6 = scalar_lea.sflag [#allocation4], %s658_s18  ;;  %s472_s7 = scalar_lea.vmem %s264_s5, 128 }
 0x189   : > { %p473_p11 = scmp.ne.s32.totalorder %s264_s5, %s472_s7  ;;  %s557_s8 = smov [#allocation5]  }
 0x18a   : > { %s476_s15 = sshll.u32 %s557_s8, 4  ;;  %s477_s15 = int_to_ptr.vmem [resolvable:$false] %s476_s15 }
 0x18b   : > { %p474_p13 = pnand %p473_p11, %p624_p9  ;;  %s478_s16 = scalar_lea.vmem %s477_s15, 256 }
 0x18c   : > { %p479_p1 = scmp.lt.s32.totalorder %s264_s5, %s477_s15  ;;  %p480_p2 = scmp.lt.s32.totalorder %s478_s16, %s472_s7 }
 0x18d   : > { %p475_p0 = pneg %p474_p13 }
 0x18e   : > { %p481_p3 = por %p480_p2, %p479_p1 }
 0x190   : > { %p482_p5 = pnand %p481_p3, %p475_p0 }
 0x192   : > { %485 = shalt.err (!%p482_p5)
}
 0x193   : > { %s486_s12 = scalar_lea.hbm %s261_s4, 128  ;;  %s490_s20 = scalar_lea.hbm %s725_s2, 512 }
 0x194   : > { %p487_p6 = scmp.ne.s32.totalorder %s261_s4, %s486_s12  ;;  %p491_p4 = scmp.lt.s32.totalorder %s261_s4, %s725_s2 }
 0x195   : > { %p492_p12 = scmp.lt.s32.totalorder %s490_s20, %s486_s12 }
 0x196   : > { %p488_p7 = pnand %p487_p6, %p624_p9 }
 0x197   : > { %p493_p8 = por %p492_p12, %p491_p4 }
 0x198   : > { %p489_p10 = pneg %p488_p7 }
 0x19a   : > { %p494_p11 = pnand %p493_p8, %p489_p10 }
 0x19c   : > { %497 = shalt.err (!%p494_p11)
}
 0x19d   : > { %379 = dma.vmem_to_hbm [thread:$0]  (%p624_p9), %s264_s5, 128, %s261_s4, %s248_s6  }
 0x19e PF: > { %p390_p13 = scmp.ge.s32.totalorder %s552_s14, 2  ;;  %s275_s27 = sand.u32 1, %s532_s9  }
 0x19f   : > { %p731_p0 = scmp.ne.s32.totalorder %s729_s24, 0  ;;  %s276_s28 = scalar_lea.sflag [#allocation4], %s275_s27 }
 0x1a1   : > { %p386_p1 = pnand %p390_p13, %p731_p0 }
 0x1a3   : > { %p387_p2 = pneg %p386_p1 }
 0x1a5   : > { %527 = dma.done.wait (%p387_p2), %s276_s28, 128  }
 0x1a6   : > { %529 = vsyncadd (%p387_p2), %s276_s28, 4294967168  ;;  %s18_s14 = sadd.s32 1, %s552_s14   ;;  %s732_s9 = smov %s536_s10 }
 0x1a7   : > { %p15_p3 = scmp.ge.s32.totalorder %s18_s14, 6   ;;  %s733_s10 = smov %s540_s11 }
 0x1a8   : > { %s734_s11 = smov %s629_s23  ;;  %s735_s12 = smov %s548_s13 }
 0x1a9   : > { %s736_s13 = smov %s738_s17  ;;  %17 = sbr.rel (!%p15_p3) target bundleno = 6 (0x6), region = 84 }
 0x1ae   :  { %281 = vsyncpa [#allocation3], 1 }
 0x1af   :  { %283 = vsyncpa [#allocation3 + $0x1], 1 }
 0x1b0   :  { %284 = vsyncpa [#allocation4], 1 }
 0x1b1   :  { %286 = vsyncpa [#allocation4 + $0x1], 1 }

</bundles_post_ra>
